<compile_context>
chip_gen: v6e
topology: v6e:2x2x1
jax: 0.10.0
libtpu: 0.0.40
codegen_flags: <defaults>
</compile_context>

<pallas_src>
import functools

import jax
import jax.numpy as jnp
from jax.experimental import pallas as pl
from jax.experimental.pallas import tpu as pltpu


def _outconv_vpu_kernel(x_ref, w_ref, b_ref, o_ref, *, c_in):
    # x_ref: (C_in, tl) VMEM   w_ref: (C_out, C_in) VMEM   b_ref: (C_out, 1) VMEM
    # Dense (C_out, tl) accumulator: each term is a sublane-broadcast x row times
    # a lane-broadcast weight column -> C_in dense VPU FMAs per tile, one direct
    # lane-dense store. No sublane-sparse slices, no concatenate.
    x = x_ref[...].astype(jnp.float32)
    w = w_ref[...].astype(jnp.float32)
    acc = x[0:1, :] * w[:, 0:1]                       # (C_out, tl)
    for ci in range(1, c_in):                         # static tiny unroll
        acc = acc + x[ci:ci + 1, :] * w[:, ci:ci + 1]
    o_ref[...] = (acc + b_ref[...]).astype(o_ref.dtype)


def _outconv_mxu_kernel(x_ref, w_ref, b_ref, o_ref):
    # Single MXU dot per tile: (C_out, C_in) @ (C_in, tl) -> (C_out, tl), f32 acc.
    acc = jax.lax.dot_general(
        w_ref[...], x_ref[...],
        dimension_numbers=(((1,), (0,)), ((), ())),
        preferred_element_type=jnp.float32)
    o_ref[...] = (acc + b_ref[...]).astype(o_ref.dtype)


# Target HBM traffic (x tile + y tile) per grid step.  Double-buffered this is
# ~2x resident in VMEM, well under every generation's capacity (v7x: 64 MiB).
_STEP_BYTES_TARGET = 8 * 1024 * 1024
_VMEM_LIMIT_CAP = 48 * 1024 * 1024      # stays below v7x's 64 MiB physical VMEM


def _choose_lane_tile(HW, C_in, C_out, N):
    bytes_per_lane = 4 * (C_in + C_out)
    if HW * bytes_per_lane <= _STEP_BYTES_TARGET:
        tl = HW                                          # whole spatial axis
    else:
        tl = (_STEP_BYTES_TARGET // bytes_per_lane) // 128 * 128
        tl = max(128, min(tl, (HW // 128) * 128))
    # Megacore (v7x): keep >=2 lane blocks when the batch axis gives no
    # parallelism, but only if each half still moves enough bytes to amortize
    # the ~0.35 us per-step overhead.
    if N == 1 and tl == HW:
        half = (HW // 2) // 128 * 128
        if half > 0 and half * bytes_per_lane >= (1 << 20):
            tl = half
    return tl


def outconv_1x1(x_nchw, weight, bias, *, lane_tile=None):
    """Forward of torch.nn.Conv2d(C_in, C_out, kernel_size=1) on NCHW input.

    x_nchw: (N, C_in, H, W)   weight: (C_out, C_in, 1, 1)   bias: (C_out,)
    returns (N, C_out, H, W)
    """
    N, C_in, H, W = x_nchw.shape
    C_out = weight.shape[0]
    HW = H * W

    # Free contiguous reshapes -- no transpose, no extra HBM pass.
    x = x_nchw.reshape(N, C_in, HW)
    w = weight.reshape(C_out, C_in)
    b = bias.reshape(C_out, 1)

    tl = _choose_lane_tile(HW, C_in, C_out, N) if lane_tile is None else lane_tile
    assert tl == HW or tl % 128 == 0, "lane tile must be 128-aligned or full"

    grid = (N, pl.cdiv(HW, tl))   # tail block (if any) is masked on write-back

    if C_in * C_out <= 16:
        kernel = functools.partial(_outconv_vpu_kernel, c_in=C_in)
    else:
        kernel = _outconv_mxu_kernel

    per_step_bytes = 4 * (C_in + C_out) * tl
    vmem_limit = int(min(_VMEM_LIMIT_CAP,
                         max(16 * 1024 * 1024, 3 * per_step_bytes)))

    cost = pl.CostEstimate(
        flops=2 * N * HW * C_in * C_out,
        transcendentals=0,
        bytes_accessed=4 * (N * (C_in + C_out) * HW + C_in * C_out + C_out),
    )

    out = pl.pallas_call(
        kernel,
        out_shape=jax.ShapeDtypeStruct((N, C_out, HW), x_nchw.dtype),
        grid=grid,
        in_specs=[
            pl.BlockSpec((None, C_in, tl), lambda n, j: (n, 0, j)),  # x tile
            pl.BlockSpec((C_out, C_in), lambda n, j: (0, 0)),        # resident W
            pl.BlockSpec((C_out, 1), lambda n, j: (0, 0)),           # resident b
        ],
        out_specs=pl.BlockSpec((None, C_out, tl), lambda n, j: (n, 0, j)),
        compiler_params=pltpu.CompilerParams(
            dimension_semantics=("parallel", "parallel"),   # megacore sharding
            vmem_limit_bytes=vmem_limit,
        ),
        cost_estimate=cost,
    )(x, w, b)

    return out.reshape(N, C_out, H, W)


def _ref(x, weight, bias):
    c_out, c_in = weight.shape[0], weight.shape[1]
    return (jnp.einsum("nchw,oc->nohw", x, weight.reshape(c_out, c_in))
            + bias.reshape(1, c_out, 1, 1))


if __name__ == "__main__":
    key = jax.random.PRNGKey(0)
    k_x, k_w, k_b, k_x2, k_x3, k_w3, k_b3, k_x4 = jax.random.split(key, 8)

    # OutConv-like shapes: tiny channels -> dense-VPU path, resident W/b.
    N, C_in, C_out, H, W = 2, 4, 3, 16, 16
    x = jax.random.normal(k_x, (N, C_in, H, W), dtype=jnp.float32)
    bound = 1.0 / (C_in ** 0.5)
    weight = jax.random.uniform(k_w, (C_out, C_in, 1, 1),
                                minval=-bound, maxval=bound, dtype=jnp.float32)
    bias = jax.random.uniform(k_b, (C_out,),
                              minval=-bound, maxval=bound, dtype=jnp.float32)

    y = jax.block_until_ready(outconv_1x1(x, weight, bias))
    assert y.shape == (N, C_out, H, W)
    assert jnp.allclose(y, _ref(x, weight, bias), atol=1e-5, rtol=1e-5)

    # Partial-last-block check: H*W = 288 with a forced 128 lane tile (tail=32).
    x2 = jax.random.normal(k_x2, (1, C_in, 16, 18), dtype=jnp.float32)
    y2 = jax.block_until_ready(outconv_1x1(x2, weight, bias, lane_tile=128))
    assert jnp.allclose(y2, _ref(x2, weight, bias), atol=1e-5, rtol=1e-5)

    # Larger-channel configuration -> MXU path.
    C3_in, C3_out = 64, 48
    x3 = jax.random.normal(k_x3, (1, C3_in, 8, 16), dtype=jnp.float32)
    w3 = jax.random.uniform(k_w3, (C3_out, C3_in, 1, 1),
                            minval=-0.1, maxval=0.1, dtype=jnp.float32)
    b3 = jax.random.uniform(k_b3, (C3_out,),
                            minval=-0.1, maxval=0.1, dtype=jnp.float32)
    y3 = jax.block_until_ready(outconv_1x1(x3, w3, b3))
    assert jnp.allclose(y3, _ref(x3, w3, b3), atol=1e-4, rtol=1e-4)

    # Budget-derived tile path: large H*W, tiny channels -> multiple lane blocks
    # with a masked tail, dense-VPU body.
    x4 = jax.random.normal(k_x4, (1, C_in, 576, 576), dtype=jnp.float32)
    y4 = jax.block_until_ready(outconv_1x1(x4, weight, bias))
    assert jnp.allclose(y4, _ref(x4, weight, bias), atol=1e-4, rtol=1e-4)

    print("KERNEL_OK")
</pallas_src>

<mosaic_0001>
module attributes {stable_mosaic.version = 11 : i64} {
  func.func @_outconv_vpu_kernel(%arg0: i32, %arg1: i32, %arg2: memref<1x4x256xf32, #tpu.memory_space<vmem>>, %arg3: memref<3x4xf32, #tpu.memory_space<vmem>>, %arg4: memref<3x1xf32, #tpu.memory_space<vmem>>, %arg5: memref<1x3x256xf32, #tpu.memory_space<vmem>>) attributes {dimension_semantics = [#tpu.dimension_semantics<parallel>, #tpu.dimension_semantics<parallel>], iteration_bounds = array<i64: 2, 1>, scalar_prefetch = 0 : i64, scratch_operands = 0 : i64, tpu.core_type = #tpu.core_type<tc>, window_params = [{transform_indices = @transform_0, window_bounds = array<i64: 1, 4, 256>}, {pipeline_mode = #tpu.pipeline_mode<synchronous>, transform_indices = @transform_1, window_bounds = array<i64: 3, 4>}, {pipeline_mode = #tpu.pipeline_mode<synchronous>, transform_indices = @transform_2, window_bounds = array<i64: 3, 1>}, {transform_indices = @transform_3, window_bounds = array<i64: 1, 3, 256>}]} {
    %c0 = arith.constant 0 : index
    %c0_0 = arith.constant 0 : index
    %c0_1 = arith.constant 0 : index
    %0 = vector.load %arg2[%c0, %c0_0, %c0_1] : memref<1x4x256xf32, #tpu.memory_space<vmem>>, vector<1x4x256xf32>
    %1 = vector.shape_cast %0 : vector<1x4x256xf32> to vector<4x256xf32>
    %c0_2 = arith.constant 0 : index
    %c0_3 = arith.constant 0 : index
    %2 = vector.load %arg3[%c0_2, %c0_3] : memref<3x4xf32, #tpu.memory_space<vmem>>, vector<3x4xf32>
    %3 = vector.extract_strided_slice %1 {offsets = [0, 0], sizes = [1, 256], strides = [1, 1]} : vector<4x256xf32> to vector<1x256xf32>
    %4 = vector.extract_strided_slice %2 {offsets = [0, 0], sizes = [3, 1], strides = [1, 1]} : vector<3x4xf32> to vector<3x1xf32>
    %5 = vector.broadcast %3 : vector<1x256xf32> to vector<3x256xf32>
    %6 = vector.broadcast %4 : vector<3x1xf32> to vector<3x256xf32>
    %7 = arith.mulf %5, %6 : vector<3x256xf32>
    %8 = vector.extract_strided_slice %1 {offsets = [1, 0], sizes = [1, 256], strides = [1, 1]} : vector<4x256xf32> to vector<1x256xf32>
    %9 = vector.extract_strided_slice %2 {offsets = [0, 1], sizes = [3, 1], strides = [1, 1]} : vector<3x4xf32> to vector<3x1xf32>
    %10 = vector.broadcast %8 : vector<1x256xf32> to vector<3x256xf32>
    %11 = vector.broadcast %9 : vector<3x1xf32> to vector<3x256xf32>
    %12 = arith.mulf %10, %11 : vector<3x256xf32>
    %13 = arith.addf %7, %12 : vector<3x256xf32>
    %14 = vector.extract_strided_slice %1 {offsets = [2, 0], sizes = [1, 256], strides = [1, 1]} : vector<4x256xf32> to vector<1x256xf32>
    %15 = vector.extract_strided_slice %2 {offsets = [0, 2], sizes = [3, 1], strides = [1, 1]} : vector<3x4xf32> to vector<3x1xf32>
    %16 = vector.broadcast %14 : vector<1x256xf32> to vector<3x256xf32>
    %17 = vector.broadcast %15 : vector<3x1xf32> to vector<3x256xf32>
    %18 = arith.mulf %16, %17 : vector<3x256xf32>
    %19 = arith.addf %13, %18 : vector<3x256xf32>
    %20 = vector.extract_strided_slice %1 {offsets = [3, 0], sizes = [1, 256], strides = [1, 1]} : vector<4x256xf32> to vector<1x256xf32>
    %21 = vector.extract_strided_slice %2 {offsets = [0, 3], sizes = [3, 1], strides = [1, 1]} : vector<3x4xf32> to vector<3x1xf32>
    %22 = vector.broadcast %20 : vector<1x256xf32> to vector<3x256xf32>
    %23 = vector.broadcast %21 : vector<3x1xf32> to vector<3x256xf32>
    %24 = arith.mulf %22, %23 : vector<3x256xf32>
    %25 = arith.addf %19, %24 : vector<3x256xf32>
    %c0_4 = arith.constant 0 : index
    %c0_5 = arith.constant 0 : index
    %26 = vector.load %arg4[%c0_4, %c0_5] : memref<3x1xf32, #tpu.memory_space<vmem>>, vector<3x1xf32>
    %27 = vector.broadcast %26 : vector<3x1xf32> to vector<3x256xf32>
    %28 = arith.addf %25, %27 : vector<3x256xf32>
    %c0_6 = arith.constant 0 : index
    %c0_7 = arith.constant 0 : index
    %c0_8 = arith.constant 0 : index
    %29 = vector.load %arg5[%c0_6, %c0_7, %c0_8] : memref<1x3x256xf32, #tpu.memory_space<vmem>>, vector<1x3x256xf32>
    %30 = vector.shape_cast %29 : vector<1x3x256xf32> to vector<3x256xf32>
    %31 = vector.shape_cast %28 : vector<3x256xf32> to vector<1x3x256xf32>
    tpu.vector_store %arg5[%c0_6, %c0_7, %c0_8], %31 {strides = array<i32>} : memref<1x3x256xf32, #tpu.memory_space<vmem>>, vector<1x3x256xf32>,
    return
  }
  func.func @transform_0(%arg0: i32, %arg1: i32) -> (i32, i32, i32) {
    %c0_i32 = arith.constant 0 : i32
    %c0_i32_0 = arith.constant 0 : i32
    return %arg0, %c0_i32, %arg1 : i32, i32, i32
  }
  func.func @transform_1(%arg0: i32, %arg1: i32) -> (i32, i32) {
    %c0_i32 = arith.constant 0 : i32
    %c0_i32_0 = arith.constant 0 : i32
    %c0_i32_1 = arith.constant 0 : i32
    return %c0_i32, %c0_i32_0 : i32, i32
  }
  func.func @transform_2(%arg0: i32, %arg1: i32) -> (i32, i32) {
    %c0_i32 = arith.constant 0 : i32
    %c0_i32_0 = arith.constant 0 : i32
    %c0_i32_1 = arith.constant 0 : i32
    return %c0_i32, %c0_i32_0 : i32, i32
  }
  func.func @transform_3(%arg0: i32, %arg1: i32) -> (i32, i32, i32) {
    %c0_i32 = arith.constant 0 : i32
    %c0_i32_0 = arith.constant 0 : i32
    return %arg0, %c0_i32, %arg1 : i32, i32, i32
  }
}

</mosaic_0001>

<bundles_post_ra>
// kernel: tpu_custom_call.1
= control target key start
LH: loop header
LB: loop body
LE: loop exit
PB: predicated region body
PF: predicated region fallthrough
CT: control target
= control target key end

     0   :  { %8 = vsyncpa [#allocation3], 0  ;;  %s722_s0 = inlined_call_operand.hbm [shape: f32[2,4,256], index: 0, kind: input, shape index: {}]   ;;  %s723_s1 = inlined_call_operand.vmem [shape: f32[3,4], index: 1, kind: input, shape index: {}]   ;;  %s724_s2 = inlined_call_operand.vmem [shape: f32[3,1], index: 2, kind: input, shape index: {}]   ;;  %s725_s3 = inlined_call_operand.vmem [shape: f32[2,3,256], index: 3, kind: output, shape index: {}]  }
   0x1   :  { %10 = vsyncpa [#allocation3 + $0x1], 0  ;;  %s616_s12 = smov 0   ;;  %s618_s13 = smov 0  }
   0x2   :  { %s620_s14 = smov 0   ;;  %s622_s15 = smov 0  }
   0x3   :  { %s624_s16 = smov 0   ;;  %s626_s17 = smov 0  }
   0x4 LB: > { %s431_s18 = sadd.s32 4294967295, %s589_s17   ;;  %s28_s19 = sadd.s32 1, %s585_s16  ;;  %s589_s17 = sphi %s626_s17, %s16_s17   ;;  %s585_s16 = sphi %s624_s16, %s733_s16   ;;  %s581_s15 = sphi %s622_s15, %s732_s15   ;;  %s577_s14 = sphi %s620_s14, %s731_s14   ;;  %s573_s13 = sphi %s618_s13, %s730_s13   ;;  %s569_s12 = sphi %s616_s12, %s729_s12  }
   0x5   : > { %p30_p0 = scmp.ge.s32.totalorder %s28_s19, 2  ;;  %s37_s20 = sadd.s32 1, %s577_s14 }
   0x6   : > { %p44_p1 = scmp.ne.s32.totalorder %s577_s14, %s573_s13  ;;  %p45_p2 = scmp.eq.s32.totalorder %s589_s17, 0 }
   0x7   : > { %s735_s19 = smov (%p30_p0, %s28_s19), 0  ;;  %p50_p4 = scmp.ne.s32.totalorder %s573_s13, %s569_s12 }
   0x8   : > { %p652_p3 = por %p45_p2, %p44_p1  ;;  %s32_s22 = ssub.s32 %s585_s16, %s735_s19 }
   0x9   : > { %p51_p5 = scmp.eq.s32.totalorder %s431_s18, 0  ;;  %p35_p6 = scmp.eq.s32.totalorder %s32_s22, 0 }
   0xa   : > { %p452_p8 = scmp.lt.s32.totalorder %s589_s17, 2  ;;  %s150_s25 = sand.u32 1, %s577_s14  }
   0xb   : > { %p659_p7 = por %p51_p5, %p50_p4  ;;  %s444_s26 = sshll.u32 %s585_s16, 7 }
   0xc   : > { %s665_s24 = scalar_select %p35_p6, %s577_s14, %s37_s20  }
   0xd   : > { %s435_s27 = sshll.u32 %s150_s25, 3  ;;  %s162_s30 = scalar_lea.hbm %s722_s0, %s444_s26 }
   0xe   : > { %s154_s4 = scalar_lea.vmem [#allocation2], %s435_s27  ;;  %p674_p9 = pnand %p452_p8, %p652_p3 }
   0xf   : > { %s164_s5 = sshll.u32 %s154_s4, 4  ;;  %p438_p10 = scmp.ge.s32.totalorder %s589_s17, 1  ;;  %s165_s5 = int_to_ptr.vmem [resolvable:$true] %s164_s5 }
  0x10   : > { %p169_p11 = scmp.lt.s32.totalorder %s589_s17, 3  ;;  %s151_s7 = scalar_lea.sflag [#allocation3], %s150_s25 }
  0x11   : > { %p513_p12 = pneg %p674_p9  ;;  %s524_s8 = scalar_lea.vmem %s165_s5, 128 }
  0x12   : > { %p525_p13 = scmp.ne.s32.totalorder %s165_s5, %s524_s8  ;;  %s591_s9 = smov [#allocation2]  }
  0x13   : > { %s529_s10 = sshll.u32 %s591_s9, 4  ;;  %s530_s10 = int_to_ptr.vmem [resolvable:$false] %s529_s10 }
  0x14   : > { %p527_p0 = pnand %p525_p13, %p513_p12  ;;  %s531_s11 = scalar_lea.vmem %s530_s10, 256 }
  0x15   : > { %p532_p2 = scmp.lt.s32.totalorder %s165_s5, %s530_s10  ;;  %p533_p3 = scmp.lt.s32.totalorder %s531_s11, %s524_s8 }
  0x16   : > { %p528_p1 = pneg %p527_p0 }
  0x17   : > { %p534_p4 = por %p533_p3, %p532_p2 }
  0x19   : > { %p535_p5 = pnand %p534_p4, %p528_p1 }
  0x1b   : > { %538 = shalt.err (!%p535_p5)
}
  0x1c   : > { %451 = dma.hbm_to_vmem [thread:$0]  (!%p674_p9), %s162_s30, 128, %s165_s5, %s151_s7  }
  0x1d   : > { %p170_p6 = pnand %p438_p10, %p169_p11 }
  0x1e   : > { %s175_s12 = sand.u32 (!%p170_p6), 1, %s573_s13  }
  0x1f   : > { %173 = sbr.rel (%p170_p6) target bundleno = 181 (0xb5), region = 32  ;;  %s439_s18 = sshll.u32 (!%p170_p6), %s175_s12, 3 }
  0x20   : > { %s176_s20 = scalar_lea.sflag (!%p170_p6), [#allocation3], %s175_s12  ;;  %s179_s21 = scalar_lea.vmem (!%p170_p6), [#allocation2], %s439_s18 }
  0x24   : > { %564 = dma.done.wait (%p659_p7), %s176_s20, 128  }
  0x25   : > { %566 = vsyncadd (%p659_p7), %s176_s20, 4294967168  ;;  %v592_v0 = vmov 0   ;;  %v593_v1 = vmov 2   ;;  %v218_v2 = vld [vmem:[%s723_s1] sm:$0x7]  ;;  %v594_v3 = vmov 1   ;;  %v220_v6 = vlaneseq }
  0x26   : > { %505 = vset.pattern.permute.xlu0 %v592_v0  ;;  %507 = vset.pattern.permute.xlu1 %v593_v1  ;;  %v595_v4 = vmov 3   ;;  %v323_v5 = vld [vmem:[%s724_s2] sm:$0x7]  ;;  %p208_p7 = scmp.lt.s32.totalorder %s581_s15, 1 }
  0x27   : > { %240 = vperm.xlu0 %505, %v218_v2   ;;  %290 = vperm.xlu1 %507, %v218_v2   ;;  %v221_v7 = vshrl.u32 %v220_v6, 7  ;;  %v217_v12 = vld [vmem:[%s179_s21] sm:$0xff] }
  0x28   : > { %s737_s15 = smov (!%p208_p7, %s581_s15), 1 }
  0x29   : > { %v222_v8 = vsub.s32 0, %v221_v7  ;;  %v226_v9 = vsub.s32 4, %v221_v7  ;;  %v247_v10 = vsub.s32 1, %v221_v7  ;;  %v251_v11 = vsub.s32 5, %v221_v7  ;;  %s445_s23 = sshll.u32 %s737_s15, 3 }
  0x2a   : > { %v273_v13 = vsub.s32 2, %v221_v7  ;;  %v277_v14 = vsub.s32 6, %v221_v7  ;;  %v299_v15 = vsub.s32 3, %v221_v7  ;;  %v303_v16 = vsub.s32 7, %v221_v7  ;;  %s215_s30 = scalar_lea.vmem %s725_s3, %s445_s23 }
  0x2b   : > { %506 = vset.pattern.permute.xlu0 %v594_v3  ;;  %508 = vset.pattern.permute.xlu1 %v595_v4  ;;  %v223_v17 = vrot.slane %v217_v12, %v222_v8  ;;  %v227_v18 = vrot.slane %v217_v12, %v226_v9  ;;  %v248_v19 = vrot.slane %v217_v12, %v247_v10 }
  0x2c   : > { %264 = vperm.xlu0 %506, %v218_v2   ;;  %316 = vperm.xlu1 %508, %v218_v2   ;;  %v252_v20 = vrot.slane %v217_v12, %v251_v11  ;;  %v274_v21 = vrot.slane %v217_v12, %v273_v13  ;;  %v278_v22 = vrot.slane %v217_v12, %v277_v14 }
  0x2d   : > { %v300_v25 = vrot.slane %v217_v12, %v299_v15  ;;  %v304_v26 = vrot.slane %v217_v12, %v303_v16  ;;  %v233_v27 = vrot.slane %v223_v17, %v222_v8  ;;  %v237_v28 = vrot.slane %v227_v18, %v222_v8 }
  0x2e   : > { %v258_v29 = vrot.slane %v248_v19, %v247_v10  ;;  %v262_v30 = vrot.slane %v252_v20, %v247_v10  ;;  %v284_v31 = vrot.slane %v274_v21, %v273_v13  ;;  %v288_v32 = vrot.slane %v278_v22, %v273_v13 }
  0x2f   : > { %v310_v33 = vrot.slane %v300_v25, %v299_v15  ;;  %v314_v34 = vrot.slane %v304_v26, %v299_v15 }
  0x30   : > { %509 = vset.pattern.permute.xlu1 %v592_v0  ;;  %510 = vset.pattern.permute.xlu0 %v592_v0 }
  0x31   : > { %326 = vperm.xlu1 %509, %v323_v5  }
  0xa2   : > { %v241_v23 = vpop.permute.xlu0 %240  ;;  %v291_v24 = vpop.permute.xlu1 %290 }
  0xa3   : > { %v243_v37 = vmul.f32 %v241_v23, %v233_v27  ;;  %v244_v38 = vmul.f32 %v241_v23, %v237_v28  ;;  %v293_v41 = vmul.f32 %v291_v24, %v284_v31  ;;  %v294_v42 = vmul.f32 %v291_v24, %v288_v32 }
  0xa7   : > { %v265_v35 = vpop.permute.xlu0 %264  ;;  %v317_v36 = vpop.permute.xlu1 %316 }
  0xa8   : > { %v267_v39 = vmul.f32 %v265_v35, %v258_v29  ;;  %v268_v40 = vmul.f32 %v265_v35, %v262_v30  ;;  %v319_v45 = vmul.f32 %v317_v36, %v310_v33  ;;  %v320_v46 = vmul.f32 %v317_v36, %v314_v34 }
  0xaa   : > { %v269_v43 = vadd.f32 %v267_v39, %v243_v37  ;;  %v270_v44 = vadd.f32 %v268_v40, %v244_v38 }
  0xac   : > { %v295_v47 = vadd.f32 %v293_v41, %v269_v43  ;;  %v296_v48 = vadd.f32 %v294_v42, %v270_v44  ;;  %v327_v49 = vpop.permute.xlu1 %326 }
  0xae   : > { %v321_v50 = vadd.f32 %v319_v45, %v295_v47  ;;  %v322_v51 = vadd.f32 %v320_v46, %v296_v48 }
  0xb0   : > { %v329_v52 = vadd.f32 %v327_v49, %v321_v50  ;;  %v330_v53 = vadd.f32 %v327_v49, %v322_v51 }
  0xb2   : > { %v333_v54 = vcombine.low %v329_v52, %v330_v53 }
  0xb4   : > { %335 = vst [vmem:[%s215_s30] sm:$0x77] %v333_v54 }
  0xb5 PF: > { %s16_s17 = sadd.s32 1, %s589_s17   ;;  %s729_s12 = smov %s573_s13 }
  0xb6   : > { %p13_p8 = scmp.ge.s32.totalorder %s16_s17, 4   ;;  %s730_s13 = smov %s577_s14 }
  0xb7   : > { %s731_s14 = smov %s665_s24  ;;  %s732_s15 = smov %s585_s16 }
  0xb8   : > { %s733_s16 = smov %s735_s19  ;;  %15 = sbr.rel (!%p13_p8) target bundleno = 4 (0x4), region = 72 }
  0xbd   :  { %366 = vsyncpa [#allocation3], 1 }
  0xbe   :  { %368 = vsyncpa [#allocation3 + $0x1], 1 }

</bundles_post_ra>
